<compile_context>
chip_gen: v5e
topology: v5e:2x2
jax: 0.10.0
libtpu: 0.0.40
codegen_flags: <defaults>
</compile_context>

<pallas_src>
import math
import jax
import jax.numpy as jnp
from jax.experimental import pallas as pl
from jax.experimental.pallas import tpu as pltpu


def _make_qk_kernel(offset_input: float, offset_weight: float, head_dim: int):
    """Kernel body for one (tm, tn) output tile of one (batch*head) slice.

    amp_coefficient is pre-folded into the mask tile, so the body computes
        ((x@w) - ow*rowsum(x) - oi*colsum(w) + oi*ow*D) * mask_scaled
    which equals amp * ((x-oi)@(w-ow)) * mask.
    """
    oi = float(offset_input)
    ow = float(offset_weight)

    def kernel(x_ref, w_ref, m_ref, o_ref):
        # Native-dtype tiles straight into the MXU; accumulate in f32.
        acc = jnp.dot(x_ref[...], w_ref[...], preferred_element_type=jnp.float32)

        # Offset correction terms (compile-time gated: skipped if offsets are 0).
        if ow != 0.0:
            row_sum = jnp.sum(x_ref[...].astype(jnp.float32), axis=-1, keepdims=True)
            acc = acc - jnp.float32(ow) * row_sum          # (tm, 1) broadcast
        if oi != 0.0:
            col_sum = jnp.sum(w_ref[...].astype(jnp.float32), axis=0, keepdims=True)
            acc = acc - jnp.float32(oi) * col_sum          # (1, tn) broadcast
        if oi != 0.0 and ow != 0.0:
            acc = acc + jnp.float32(oi * ow * head_dim)

        # Mask tile is already f32 and already carries amp_coefficient.
        o_ref[...] = (acc * m_ref[...]).astype(o_ref.dtype)

    return kernel


def _pick_tile(T: int) -> int:
    """Largest MXU-friendly tile that divides T; fall back to the full extent."""
    for cand in (512, 256, 128):
        if T % cand == 0:
            return cand
    return T


def _vmem_budget_bytes(tm: int, tn: int, D: int, in_dtype, out_dtype) -> int:
    """Explicit scoped-VMEM limit: double-buffered x/w/out tiles + resident mask,
    2x headroom, floored at 32 MiB and capped safely under v7x's 64 MiB physical."""
    isz = jnp.dtype(in_dtype).itemsize
    osz = jnp.dtype(out_dtype).itemsize
    need = 2 * (tm * D * isz + D * tn * isz + tm * tn * osz) + tm * tn * 4
    return int(min(max(2 * need, 32 * 1024 * 1024), 48 * 1024 * 1024))


def offset_weights_matmul_qk(x, weights, decay_mask,
                             offset_input: float, offset_weight: float,
                             amp_coefficient: float, *, tm=None, tn=None):
    """Pallas TPU implementation of offset_weights_matmul_QK.forward.

    x:          (B, H, T, D)
    weights:    (B, H, D, T)
    decay_mask: (T, T)       (broadcast over B, H)
    returns:    (B, H, T, T) in x.dtype
    """
    B, H, T, D = x.shape
    assert weights.shape == (B, H, D, T)
    assert decay_mask.shape == (T, T)

    BH = B * H
    x_f = x.reshape(BH, T, D)
    w_f = weights.reshape(BH, D, T)

    # Fold amp_coefficient (and the f32 cast) into the mask ONCE; this tile is reused
    # across all BH * (T/tm) * (T/tn) grid steps, so the fold is genuinely amortized.
    mask_scaled = decay_mask.astype(jnp.float32) * jnp.float32(amp_coefficient)

    if tm is None:
        tm = _pick_tile(T)
    if tn is None:
        tn = _pick_tile(T)
    assert T % tm == 0 and T % tn == 0

    kernel = _make_qk_kernel(offset_input, offset_weight, D)

    # BH innermost: the mask block index (ti, tj) is constant along it -> mask stays
    # resident in VMEM for the whole BH sweep (no per-step mask re-DMA).
    grid = (T // tm, T // tn, BH)

    out = pl.pallas_call(
        kernel,
        out_shape=jax.ShapeDtypeStruct((BH, T, T), x.dtype),
        grid_spec=pltpu.PrefetchScalarGridSpec(
            num_scalar_prefetch=0,
            grid=grid,
            in_specs=[
                # one (tm, D) query tile of slice b
                pl.BlockSpec((None, tm, D), lambda ti, tj, b: (b, ti, 0)),
                # one (D, tn) key tile of slice b
                pl.BlockSpec((None, D, tn), lambda ti, tj, b: (b, 0, tj)),
                # (tm, tn) mask tile — index independent of b => resident
                pl.BlockSpec((tm, tn), lambda ti, tj, b: (ti, tj)),
            ],
            out_specs=pl.BlockSpec((None, tm, tn), lambda ti, tj, b: (b, ti, tj)),
        ),
        compiler_params=pltpu.CompilerParams(
            dimension_semantics=("parallel", "parallel", "parallel"),
            vmem_limit_bytes=_vmem_budget_bytes(tm, tn, D, x.dtype, x.dtype),
        ),
    )(x_f, w_f, mask_scaled)

    return out.reshape(B, H, T, T)


def build_decay_mask(T: int, decay_factor: float, dtype=jnp.float32):
    """Mirrors the PyTorch `decay_mask` module's buffer construction:
       mask = causal lower-triangular ones, then
       decay_mask = exp(-decay_factor) ** (cumsum(mask, dim=-2) - 1)."""
    mask = jnp.tril(jnp.ones((T, T), dtype=dtype))
    cum = jnp.cumsum(mask, axis=-2) - 1.0
    decay = math.exp(-decay_factor)
    return (decay ** cum).astype(dtype)


if __name__ == "__main__":
    # Small deterministic shapes: batch=2, heads=4, seq=256, head_dim=32.
    # tm=tn=128 is passed explicitly so the demo exercises a real (2, 2, 8) tiled grid.
    B, H, T, D = 2, 4, 256, 32
    offset_input = 0.25
    offset_weight = -0.5
    amp_coefficient = 1.0 / math.sqrt(D)
    decay_factor = 0.1

    key = jax.random.PRNGKey(0)
    kx, kw = jax.random.split(key)
    x = jax.random.normal(kx, (B, H, T, D), dtype=jnp.float32)
    weights = jax.random.normal(kw, (B, H, D, T), dtype=jnp.float32)
    dmask = build_decay_mask(T, decay_factor)

    out = offset_weights_matmul_qk(x, weights, dmask,
                                   offset_input, offset_weight, amp_coefficient,
                                   tm=128, tn=128)
    out = jax.block_until_ready(out)

    # Pure-JAX reference (PyTorch forward semantics).
    ref = amp_coefficient * jnp.matmul(x - offset_input, weights - offset_weight)
    ref = ref * dmask  # broadcast over (B, H)
    assert out.shape == (B, H, T, T)
    assert jnp.allclose(out, ref, atol=1e-4, rtol=1e-4), "mismatch vs reference"

    print("KERNEL_OK")
</pallas_src>

<mosaic_0001>
module attributes {stable_mosaic.version = 11 : i64} {
  func.func @kernel(%arg0: i32, %arg1: i32, %arg2: i32, %arg3: memref<1x128x32xf32, #tpu.memory_space<vmem>>, %arg4: memref<1x32x128xf32, #tpu.memory_space<vmem>>, %arg5: memref<128x128xf32, #tpu.memory_space<vmem>>, %arg6: memref<1x128x128xf32, #tpu.memory_space<vmem>>) attributes {dimension_semantics = [#tpu.dimension_semantics<parallel>, #tpu.dimension_semantics<parallel>, #tpu.dimension_semantics<parallel>], iteration_bounds = array<i64: 2, 2, 8>, scalar_prefetch = 0 : i64, scratch_operands = 0 : i64, tpu.core_type = #tpu.core_type<tc>, window_params = [{transform_indices = @transform_0, window_bounds = array<i64: 1, 128, 32>}, {transform_indices = @transform_1, window_bounds = array<i64: 1, 32, 128>}, {transform_indices = @transform_2, window_bounds = array<i64: 128, 128>}, {transform_indices = @transform_3, window_bounds = array<i64: 1, 128, 128>}]} {
    %c0 = arith.constant 0 : index
    %c0_0 = arith.constant 0 : index
    %c0_1 = arith.constant 0 : index
    %0 = vector.load %arg3[%c0, %c0_0, %c0_1] : memref<1x128x32xf32, #tpu.memory_space<vmem>>, vector<1x128x32xf32>
    %1 = vector.shape_cast %0 : vector<1x128x32xf32> to vector<128x32xf32>
    %c0_2 = arith.constant 0 : index
    %c0_3 = arith.constant 0 : index
    %c0_4 = arith.constant 0 : index
    %2 = vector.load %arg4[%c0_2, %c0_3, %c0_4] : memref<1x32x128xf32, #tpu.memory_space<vmem>>, vector<1x32x128xf32>
    %3 = vector.shape_cast %2 : vector<1x32x128xf32> to vector<32x128xf32>
    %cst = arith.constant dense<0.000000e+00> : vector<128x128xf32>
    %4 = tpu.matmul %1, %3, %cst {dimension_numbers = #tpu.dot_dimension_numbers<[1], [0], [0], [1], [0, 0, 1, 1], [], []>} : vector<128x32xf32>, vector<32x128xf32>, vector<128x128xf32> -> vector<128x128xf32>
    %c0_5 = arith.constant 0 : index
    %c0_6 = arith.constant 0 : index
    %c0_7 = arith.constant 0 : index
    %5 = vector.load %arg3[%c0_5, %c0_6, %c0_7] : memref<1x128x32xf32, #tpu.memory_space<vmem>>, vector<1x128x32xf32>
    %6 = vector.shape_cast %5 : vector<1x128x32xf32> to vector<128x32xf32>
    %cst_8 = arith.constant dense<0.000000e+00> : vector<128xf32>
    %7 = vector.multi_reduction <add>, %6, %cst_8 [1] : vector<128x32xf32> to vector<128xf32>
    %8 = vector.shape_cast %7 : vector<128xf32> to vector<128x1xf32>
    %cst_9 = arith.constant -5.000000e-01 : f32
    %9 = vector.broadcast %cst_9 : f32 to vector<128x1xf32>
    %10 = arith.mulf %9, %8 : vector<128x1xf32>
    %11 = vector.broadcast %10 : vector<128x1xf32> to vector<128x128xf32>
    %12 = arith.subf %4, %11 : vector<128x128xf32>
    %c0_10 = arith.constant 0 : index
    %c0_11 = arith.constant 0 : index
    %c0_12 = arith.constant 0 : index
    %13 = vector.load %arg4[%c0_10, %c0_11, %c0_12] : memref<1x32x128xf32, #tpu.memory_space<vmem>>, vector<1x32x128xf32>
    %14 = vector.shape_cast %13 : vector<1x32x128xf32> to vector<32x128xf32>
    %cst_13 = arith.constant dense<0.000000e+00> : vector<128xf32>
    %15 = vector.multi_reduction <add>, %14, %cst_13 [0] : vector<32x128xf32> to vector<128xf32>
    %16 = vector.shape_cast %15 : vector<128xf32> to vector<1x128xf32>
    %cst_14 = arith.constant 2.500000e-01 : f32
    %17 = vector.broadcast %cst_14 : f32 to vector<1x128xf32>
    %18 = arith.mulf %17, %16 : vector<1x128xf32>
    %19 = vector.broadcast %18 : vector<1x128xf32> to vector<128x128xf32>
    %20 = arith.subf %12, %19 : vector<128x128xf32>
    %cst_15 = arith.constant -4.000000e+00 : f32
    %21 = vector.broadcast %cst_15 : f32 to vector<128x128xf32>
    %22 = arith.addf %20, %21 : vector<128x128xf32>
    %c0_16 = arith.constant 0 : index
    %c0_17 = arith.constant 0 : index
    %23 = vector.load %arg5[%c0_16, %c0_17] : memref<128x128xf32, #tpu.memory_space<vmem>>, vector<128x128xf32>
    %24 = arith.mulf %22, %23 : vector<128x128xf32>
    %c0_18 = arith.constant 0 : index
    %c0_19 = arith.constant 0 : index
    %c0_20 = arith.constant 0 : index
    %25 = vector.load %arg6[%c0_18, %c0_19, %c0_20] : memref<1x128x128xf32, #tpu.memory_space<vmem>>, vector<1x128x128xf32>
    %26 = vector.shape_cast %25 : vector<1x128x128xf32> to vector<128x128xf32>
    %27 = vector.shape_cast %24 : vector<128x128xf32> to vector<1x128x128xf32>
    tpu.vector_store %arg6[%c0_18, %c0_19, %c0_20], %27 {strides = array<i32>} : memref<1x128x128xf32, #tpu.memory_space<vmem>>, vector<1x128x128xf32>,
    return
  }
  func.func @transform_0(%arg0: i32, %arg1: i32, %arg2: i32) -> (i32, i32, i32) {
    %c0_i32 = arith.constant 0 : i32
    %c0_i32_0 = arith.constant 0 : i32
    return %arg2, %arg0, %c0_i32 : i32, i32, i32
  }
  func.func @transform_1(%arg0: i32, %arg1: i32, %arg2: i32) -> (i32, i32, i32) {
    %c0_i32 = arith.constant 0 : i32
    %c0_i32_0 = arith.constant 0 : i32
    return %arg2, %c0_i32, %arg1 : i32, i32, i32
  }
  func.func @transform_2(%arg0: i32, %arg1: i32, %arg2: i32) -> (i32, i32) {
    %c0_i32 = arith.constant 0 : i32
    return %arg0, %arg1 : i32, i32
  }
  func.func @transform_3(%arg0: i32, %arg1: i32, %arg2: i32) -> (i32, i32, i32) {
    %c0_i32 = arith.constant 0 : i32
    return %arg2, %arg0, %arg1 : i32, i32, i32
  }
}

</mosaic_0001>

<bundles_post_ra>
// kernel: tpu_custom_call.1
= control target key start
LH: loop header
LB: loop body
LE: loop exit
PB: predicated region body
PF: predicated region fallthrough
CT: control target
= control target key end

     0   :  { %s1650_s0 = inlined_call_operand.vmem [shape: f32[8,256,32], index: 0, kind: input, shape index: {}]   ;;  %s1651_s1 = inlined_call_operand.hbm [shape: f32[8,32,256], index: 1, kind: input, shape index: {}]   ;;  %s1652_s2 = inlined_call_operand.hbm [shape: f32[256,256], index: 2, kind: input, shape index: {}]   ;;  %s1653_s3 = inlined_call_operand.hbm [shape: f32[8,256,256], index: 3, kind: output, shape index: {}]  }
   0x1   :  { %1673 = sst [smem:[#allocation25_spill]] %s1650_s0 }
   0x2   :  { %1674 = sst [smem:[#allocation26_spill]] %s1651_s1 }
   0x3   :  { %1675 = sst [smem:[#allocation27_spill]] %s1653_s3 }
   0x4   :  { %8 = vsyncpa [#allocation3], 0 }
   0x5   :  { %10 = vsyncpa [#allocation3 + $0x1], 0 }
   0x6   :  { %11 = vsyncpa [#allocation6], 0 }
   0x7   :  { %13 = vsyncpa [#allocation6 + $0x1], 0 }
   0x8   :  { %14 = vsyncpa [#allocation4], 0 }
   0x9   :  { %16 = vsyncpa [#allocation4 + $0x1], 0  ;;  %s1226_s12 = smov 0   ;;  %s1228_s13 = smov 0  }
   0xa   :  { %s1230_s14 = smov 0   ;;  %s1232_s15 = smov 0  }
   0xb   :  { %s1234_s16 = smov 0   ;;  %s1236_s17 = smov 0  }
   0xc   :  { %s1238_s18 = smov 0   ;;  %s1240_s19 = smov 0  }
   0xd   :  { %s1242_s20 = smov 0   ;;  %s1244_s21 = smov 0  }
   0xe   :  { %s1246_s22 = smov 0   ;;  %s1248_s23 = smov 0  }
   0xf   :  { %s1250_s24 = smov 0   ;;  %s1252_s25 = smov 0  }
  0x10   :  { %s1254_s26 = smov 0   ;;  %s1256_s27 = smov 0  }
  0x11 LB: > { %1676 = sst [smem:[#allocation11_spill]] %s1138_s12  ;;  %s764_s28 = sadd.s32 4294967295, %s1198_s27   ;;  %s1198_s27 = sphi %s1256_s27, %s22_s27   ;;  %s1194_s26 = sphi %s1254_s26, %s1733_s26   ;;  %s1190_s25 = sphi %s1252_s25, %s1732_s25   ;;  %s1186_s24 = sphi %s1250_s24, %s1731_s24   ;;  %s1182_s23 = sphi %s1248_s23, %s1730_s23   ;;  %s1178_s22 = sphi %s1246_s22, %s1729_s22   ;;  %s1174_s21 = sphi %s1244_s21, %s1717_s21   ;;  %s1170_s20 = sphi %s1242_s20, %s1716_s20   ;;  %s1166_s19 = sphi %s1240_s19, %s1728_s19   ;;  %s1162_s18 = sphi %s1238_s18, %s1727_s18   ;;  %s1158_s17 = sphi %s1236_s17, %s1726_s17   ;;  %s1154_s16 = sphi %s1234_s16, %s1725_s16   ;;  %s1150_s15 = sphi %s1232_s15, %s1724_s15   ;;  %s1146_s14 = sphi %s1230_s14, %s1723_s14   ;;  %s1142_s13 = sphi %s1228_s13, %s1722_s13   ;;  %s1138_s12 = sphi %s1226_s12, %s1713_s12  }
  0x12   : > { %1677 = sst [smem:[#allocation12_spill]] %s1142_s13  ;;  %s765_s29 = sadd.s32 4294967294, %s1198_s27  }
  0x13   : > { %1678 = sst [smem:[#allocation13_spill]] %s1170_s20  ;;  %s34_s30 = sadd.s32 1, %s1186_s24 }
  0x14   : > { %1679 = sst [smem:[#allocation14_spill]] %s1174_s21  ;;  %s37_s4 = sadd.s32 1, %s1190_s25 }
  0x15   : > { %1680 = sst [smem:[#allocation15_spill]] %s1178_s22  ;;  %p35_p0 = scmp.ge.s32.totalorder %s34_s30, 8 }
  0x16   : > { %1681 = sst [smem:[#allocation16_spill]] %s1182_s23  ;;  %s78_s5 = sadd.s32 1, %s1170_s20 }
  0x17   : > { %1682 = sst [smem:[#allocation17_spill]] %s1186_s24  ;;  %p85_p1 = scmp.ne.s32.totalorder %s1170_s20, %s1166_s19 }
  0x18   : > { %p86_p2 = scmp.eq.s32.totalorder %s1198_s27, 0  ;;  %s1735_s30 = smov (%p35_p0, %s34_s30), 0 }
  0x19   : > { %1683 = sst [smem:[#allocation18_spill]] %s1735_s30  ;;  %s1737_s4 = smov (!%p35_p0, %s37_s4), %s1190_s25 }
  0x1a   : > { %s1319_s6 = ssub.s32 %s1186_s24, %s1735_s30  ;;  %p1323_p3 = por %p86_p2, %p85_p1 }
  0x1b   : > { %p39_p4 = scmp.ge.s32.totalorder %s1737_s4, 2  ;;  %p91_p5 = scmp.ne.s32.totalorder %s1166_s19, %s1162_s18 }
  0x1c   : > { %p1329_p6 = scmp.eq.s32.totalorder %s764_s28, 0  ;;  %p146_p7 = scmp.ne.s32.totalorder %s1146_s14, %s1142_s13 }
  0x1d   : > { %s1338_s9 = scalar_select %p39_p4, 0, %s1737_s4  }
  0x1e   : > { %p1342_p8 = por %p1329_p6, %p91_p5  ;;  %p147_p9 = scmp.eq.s32.totalorder %s764_s28, 31 }
  0x1f   : > { %1686 = sst [smem:[#allocation19_spill]] %s1338_s9  ;;  %s1348_s11 = ssub.s32 %s1190_s25, %s1338_s9 }
  0x20   : > { %p152_p10 = scmp.ne.s32.totalorder %s1142_s13, %s1138_s12  ;;  %s75_s18 = sor.u32 %s1348_s11, %s1319_s6 }
  0x21   : > { %p1354_p11 = por %p147_p9, %p146_p7  ;;  %p76_p12 = scmp.eq.s32.totalorder %s75_s18, 0 }
  0x22   : > { %p153_p13 = scmp.eq.s32.totalorder %s765_s29, 31  ;;  %p836_p0 = scmp.lt.s32.totalorder %s1198_s27, 32 }
  0x23   : > { %s1688_s30 = scalar_select %p1354_p11, 1, 0 }
  0x24   : > { %s1360_s3 = scalar_select %p76_p12, %s1170_s20, %s78_s5  }
  0x25   : > { %1689 = sst [smem:[#allocation20_spill]] %s1688_s30  ;;  %p1362_p1 = por %p153_p13, %p152_p10 }
  0x26   : > { %1690 = sst [smem:[#allocation21_spill]] %s1360_s3  ;;  %s186_s28 = sand.u32 1, %s1170_s20  }
  0x27   : > { %s1691_s22 = scalar_select %p1362_p1, 1, 0 }
  0x28   : > { %s768_s9 = sshll.u32 %s186_s28, 5  ;;  %s769_s12 = sshll.u32 %s1186_s24, 3 }
  0x29   : > { %1692 = sst [smem:[#allocation22_spill]] %s1691_s22  ;;  %s194_s13 = sadd.s32 %s1190_s25, %s769_s12 }
  0x2a   : > { %s190_s0 = scalar_lea.vmem [#allocation2], %s768_s9  ;;  %s770_s18 = sshll.u32 %s194_s13, 3 }
  0x2b   : > { %s199_s21 = sshll.u32 %s190_s0, 4  ;;  %s1693_s1 = sld [smem:[#allocation26_spill]]  ;;  %s200_s21 = int_to_ptr.vmem [resolvable:$true] %s199_s21 }
  0x2c   : > { %p826_p5 = pnand %p836_p0, %p1323_p3  ;;  %s187_s0 = scalar_lea.sflag [#allocation3], %s186_s28 }
  0x2d   : > { %s1662_s9 = smov 256   ;;  %s1663_s13 = smov 128  }
  0x2e   : > { %s1664_s24 = smov 8   ;;  %p775_p7 = scmp.ge.s32.totalorder %s1198_s27, 1 }
  0x2f   : > { %p231_p3 = scmp.lt.s32.totalorder %s1198_s27, 33  ;;  %s41_s7 = sadd.s32 1, %s1194_s26 }
  0x30   : > { %s1739_s7 = smov (!%p39_p4, %s41_s7), %s1194_s26  ;;  %s106_s28 = sadd.s32 1, %s1158_s17 }
  0x31   : > { %s196_s3 = scalar_lea.hbm %s1693_s1, %s770_s18  ;;  %p1381_p9 = pnand %p775_p7, %p231_p3 }
  0x32   : > { %s197_s12 = sshll.u32 %s196_s3, 4  ;;  %p113_p10 = scmp.ne.s32.totalorder %s1158_s17, %s1154_s16  ;;  %s198_s12 = int_to_ptr.hbm [resolvable:$true] %s197_s12 }
  0x33   : > { %828 = dma.hbm_to_vmem [thread:$0]  (!%p826_p5), %s198_s12, 512, %s200_s21, %s187_s0, %s1662_s9, %s1663_s13, %s1664_s24  }
  0x34   : > { %p43_p12 = scmp.ge.s32.totalorder %s1739_s7, 2  ;;  %p119_p13 = scmp.ne.s32.totalorder %s1154_s16, %s1150_s15 }
  0x35   : > { %p1396_p5 = por %p113_p10, %p86_p2  ;;  %s136_s18 = sadd.s32 1, %s1146_s14 }
  0x36   : > { %s1741_s7 = smov (%p43_p12, %s1739_s7), 0  ;;  %p1405_p7 = por %p119_p13, %p1329_p6 }
  0x37   : > { %1696 = sst [smem:[#allocation23_spill]] %s1741_s7  ;;  %s209_s29 = sand.u32 1, %s1158_s17  }
  0x38   : > { %s1697_s4 = scalar_select %p1405_p7, 1, 0 }
  0x39   : > { %s101_s5 = ssub.s32 %s1194_s26, %s1741_s7  ;;  %s771_s9 = sshll.u32 %s209_s29, 7 }
  0x3a   : > { %1698 = sst [smem:[#allocation24_spill]] %s1697_s4  ;;  %s103_s15 = sor.u32 %s101_s5, %s1348_s11 }
  0x3b   : > { %s131_s12 = sor.u32 %s101_s5, %s1319_s6  ;;  %p104_p4 = scmp.eq.s32.totalorder %s103_s15, 0 }
  0x3c   : > { %s133_s0 = sor.u32 %s131_s12, %s1348_s11  ;;  %s805_s8 = sshll.u32 %s1194_s26, 5 }
  0x3d   : > { %p134_p2 = scmp.eq.s32.totalorder %s133_s0, 0  ;;  %s218_s1 = sadd.s32 %s1190_s25, %s805_s8 }
  0x3e   : > { %s1416_s13 = scalar_select %p104_p4, %s1158_s17, %s106_s28  }
  0x3f   : > { %s1419_s24 = scalar_select %p134_p2, %s1146_s14, %s136_s18  }
  0x40   : > { %s213_s20 = scalar_lea.vmem [#allocation5], %s771_s9  ;;  %s774_s30 = sshll.u32 %s218_s1, 3 }
  0x41   : > { %s223_s22 = sshll.u32 %s213_s20, 4  ;;  %s220_s4 = scalar_lea.hbm %s1652_s2, %s774_s30  ;;  %s224_s22 = int_to_ptr.vmem [resolvable:$true] %s223_s22 }
  0x42   : > { %p829_p6 = pnand %p836_p0, %p1396_p5  ;;  %s221_s6 = sshll.u32 %s220_s4, 4  ;;  %s222_s6 = int_to_ptr.hbm [resolvable:$true] %s221_s6 }
  0x43   : > { %s210_s11 = scalar_lea.sflag [#allocation6], %s209_s29  ;;  %s1699_s28 = smov 8  }
  0x44   : > { %s1700_s5 = smov 128   ;;  %s1701_s18 = smov 256  }
  0x45   : > { %831 = dma.hbm_to_vmem [thread:$0]  (!%p829_p6), %s222_s6, 2048, %s224_s22, %s210_s11, %s1701_s18, %s1700_s5, %s1699_s28  }
  0x46   : > { %235 = sbr.rel (%p1381_p9) target bundleno = 269 (0x10d), region = 32  ;;  %s237_s1 = sand.u32 (!%p1381_p9), 1, %s1166_s19  }
  0x47   : > { %s776_s20 = sshll.u32 (!%p1381_p9), %s237_s1, 5  ;;  %s238_s9 = scalar_lea.sflag (!%p1381_p9), [#allocation3], %s237_s1 }
  0x48   : > { %s1436_s23 = scalar_lea.vmem (!%p1381_p9), [#allocation2], %s776_s20 }
  0x4b   : > { %1125 = dma.done.wait (%p1342_p8), %s238_s9, 512  }
  0x4c   : > { %1127 = vsyncadd (%p1342_p8), %s238_s9, 4294966784  ;;  %s247_s7 = sand.u32 1, %s1154_s16  }
  0x4d   : > { %s777_s21 = sshll.u32 %s247_s7, 7  ;;  %s248_s22 = scalar_lea.sflag [#allocation6], %s247_s7 }
  0x4e   : > { %s1443_s4 = scalar_lea.vmem [#allocation5], %s777_s21 }
  0x4f   : > { %1129 = dma.done.wait (%p1405_p7), %s248_s22, 2048  }
  0x50   : > { %1131 = vsyncadd (%p1405_p7), %s248_s22, 4294965248  ;;  %s1703_s3 = sld [smem:[#allocation16_spill]]  ;;  %vm321_vm0 = vcmask 261120   ;;  %v320_v0 = vld [vmem:[%s1436_s23 + $0x18] sm:$0xff]  ;;  %v319_v1 = vld [vmem:[%s1436_s23 + $0x10] sm:$0xff] }
  0x51   : > { %s1704_s29 = sld [smem:[#allocation14_spill]]  ;;  %382 = vmatpush.msra.mxu0 %v320_v0  ;;  %807 = vmatpush.msra.mxu1 %v320_v0  ;;  %v318_v6 = vld [vmem:[%s1436_s23 + $0x8] sm:$0xff]  ;;  %v317_v8 = vld [vmem:[%s1436_s23] sm:$0xff] }
  0x52   : > { %s1705_s28 = sld [smem:[#allocation25_spill]]  ;;  %808 = vmatpush.msra.mxu2 %v320_v0  ;;  %809 = vmatpush.msra.mxu3 %v320_v0  ;;  %v515_v9 = vadd.f32 %v318_v6, %v317_v8  ;;  %v557_v61 = vld [vmem:[%s1443_s4] sm:$0xff] }
  0x53   : > { %383 = vmatpush.msra.mxu0 %v319_v1  ;;  %810 = vmatpush.msra.mxu1 %v319_v1  ;;  %s1706_s18 = sld [smem:[#allocation12_spill]] }
  0x54   : > { %811 = vmatpush.msra.mxu2 %v319_v1  ;;  %812 = vmatpush.msra.mxu3 %v319_v1  ;;  %v516_v11 = vadd.f32 %v515_v9, %v319_v1  ;;  %v561_v1 = vld [vmem:[%s1443_s4 + $0x20] sm:$0xff]  ;;  %s1707_s23 = sld [smem:[#allocation15_spill]] }
  0x55   : > { %384 = vmatpush.msra.mxu0 %v318_v6  ;;  %813 = vmatpush.msra.mxu1 %v318_v6 }
  0x56   : > { %s779_s15 = sshll.u32 %s1703_s3, 4  ;;  %814 = vmatpush.msra.mxu2 %v318_v6  ;;  %815 = vmatpush.msra.mxu3 %v318_v6  ;;  %v517_v12 = vadd.f32 %v516_v11, %v320_v0  ;;  %s806_s30 = sshll.u32 %s1703_s3, 5 }
  0x57   : > { %p290_p0 = scmp.lt.s32.totalorder %s1704_s29, 7  ;;  %p292_p8 = scmp.lt.s32.totalorder %s779_s15, 31  ;;  %385 = vmatpush.msra.mxu0 %v317_v8  ;;  %816 = vmatpush.msra.mxu1 %v317_v8 }
  0x58   : > { %817 = vmatpush.msra.mxu2 %v317_v8  ;;  %818 = vmatpush.msra.mxu3 %v317_v8  ;;  %v518_v39 = vrot.slane %v517_v12, 4  ;;  %s801_s21 = sshll.u32 %s1704_s29, 6 }
  0x59   : > { %s291_s10 = scalar_select %p290_p0, %s1704_s29, 7 }
  0x5a   : > { %s1743_s15 = smov (!%p292_p8, %s779_s15), 31  ;;  %v519_v40 = vadd.f32 %v518_v39, %v517_v12  ;;  %s286_s1 = sand.u32 1, %s1706_s18  }
  0x5b   : > { %s780_s12 = sshll.u32 %s291_s10, 5  ;;  %s778_s20 = sshll.u32 %s286_s1, 7 }
  0x5c   : > { %s295_s0 = sadd.s32 %s780_s12, %s1743_s15  ;;  %v520_v41 = vrot.slane %v519_v40, 2  ;;  %s1522_s9 = scalar_lea.vmem [#allocation7], %s778_s20 }
  0x5d   : > { %s781_s8 = sshll.u32 %s295_s0, 3  ;;  %s617_s7 = sadd.s32 %s1707_s23, %s806_s30 }
  0x5e   : > { %s1457_s5 = scalar_lea.vmem %s1705_s28, %s781_s8  ;;  %v521_v44 = vadd.f32 %v520_v41, %v519_v40  ;;  %s619_s22 = sadd.s32 %s801_s21, %s617_s7 }
  0x5f   : > { %v303_v2 = vld [vmem:[%s1457_s5 + $0x10] sm:$0xff]  ;;  %v301_v3 = vld [vmem:[%s1457_s5] sm:$0xff]  ;;  %v304_v13 = vld [vmem:[%s1457_s5 + $0x18] sm:$0xff]  ;;  %s802_s3 = sshll.u32 %s619_s22, 3  ;;  %s1708_s10 = sld [smem:[#allocation27_spill]] }
  0x60   : > { %v441_v4 = vsel %vm321_vm0, %v303_v2, 0.0  ;;  %v435_v5 = vsel %vm321_vm0, %v301_v3, 0.0  ;;  %v305_v7 = vld [vmem:[%s1457_s5 + $0x20] sm:$0xff]  ;;  %v302_v14 = vld [vmem:[%s1457_s5 + $0x8] sm:$0xff]  ;;  %782 = vmatmul.msk.f32.vlgmr.msra.gmra.mxu0 %vm321_vm0, %v301_v3  ;;  %v444_v17 = vsel %vm321_vm0, %v304_v13, 0.0  ;;  %v308_v21 = vld [vmem:[%s1457_s5 + $0x38] sm:$0xff] }
  0x61   : > { %442 = vadd.xlane.f32.xlu1 %v441_v4  ;;  %436 = vadd.xlane.f32.xlu0 %v435_v5  ;;  %v447_v10 = vsel %vm321_vm0, %v305_v7, 0.0  ;;  %v309_v15 = vld [vmem:[%s1457_s5 + $0x40] sm:$0xff]  ;;  %v438_v18 = vsel %vm321_vm0, %v302_v14, 0.0  ;;  %v306_v19 = vld [vmem:[%s1457_s5 + $0x28] sm:$0xff]  ;;  %v307_v22 = vld [vmem:[%s1457_s5 + $0x30] sm:$0xff]  ;;  %v456_v25 = vsel %vm321_vm0, %v308_v21, 0.0 }
  0x62   : > { %448 = vadd.xlane.f32.xlu2 %v447_v10  ;;  %v313_v16 = vld [vmem:[%s1457_s5 + $0x60] sm:$0xff]  ;;  %786 = vmatmul.msk.f32.vlgmr.msra.gmra.mxu1 %vm321_vm0, %v305_v7  ;;  %v450_v20 = vsel %vm321_vm0, %v306_v19, 0.0  ;;  %v310_v23 = vld [vmem:[%s1457_s5 + $0x48] sm:$0xff]  ;;  %v453_v26 = vsel %vm321_vm0, %v307_v22, 0.0  ;;  %v459_v27 = vsel %vm321_vm0, %v309_v15, 0.0  ;;  %v311_v28 = vld [vmem:[%s1457_s5 + $0x50] sm:$0xff] }
  0x63   : > { %790 = vmatmul.msk.f32.vlgmr.msra.gmra.mxu2 %vm321_vm0, %v309_v15  ;;  %794 = vmatmul.msk.f32.vlgmr.msra.gmra.mxu3 %vm321_vm0, %v313_v16  ;;  %v314_v24 = vld [vmem:[%s1457_s5 + $0x68] sm:$0xff]  ;;  %v315_v29 = vld [vmem:[%s1457_s5 + $0x70] sm:$0xff]  ;;  %v465_v30 = vsel %vm321_vm0, %v311_v28, 0.0  ;;  %v462_v31 = vsel %vm321_vm0, %v310_v23, 0.0  ;;  %v312_v32 = vld [vmem:[%s1457_s5 + $0x58] sm:$0xff]  ;;  %v471_v36 = vsel %vm321_vm0, %v313_v16, 0.0 }
  0x64   : > { %v468_v33 = vsel %vm321_vm0, %v312_v32, 0.0  ;;  %v316_v34 = vld [vmem:[%s1457_s5 + $0x78] sm:$0xff]  ;;  %v474_v35 = vsel %vm321_vm0, %v314_v24, 0.0  ;;  %v477_v37 = vsel %vm321_vm0, %v315_v29, 0.0  ;;  %v522_v46 = vrot.slane %v521_v44, 1  ;;  %s622_s0 = sshll.u32 %s1522_s9, 4  ;;  %s623_s0 = int_to_ptr.vmem [resolvable:$true] %s622_s0 }
  0x65   : > { %v480_v38 = vsel %vm321_vm0, %v316_v34, 0.0  ;;  %s621_s12 = scalar_lea.hbm %s1708_s10, %s802_s3  ;;  %s606_s11 = scalar_lea.sflag [#allocation4], %s286_s1 }
  0x66   : > { %v523_v49 = vadd.f32 %v522_v46, %v521_v44  ;;  %v566_v44 = vld [vmem:[%s1443_s4 + $0x48] sm:$0xff]  ;;  %s624_s6 = sshll.u32 %s621_s12, 4  ;;  %s625_s6 = int_to_ptr.hbm [resolvable:$true] %s624_s6 }
  0x67   : > { %s1046_s28 = sshra.s32 %s625_s6, 4  ;;  %s1047_s28 = int_to_ptr.hbm [resolvable:$true] %s1046_s28 }
  0x68   : > { %783 = vmatmul.msk.f32.gmra.mxu0 %vm321_vm0, %v302_v14  ;;  %v1511_v51 = vmul.f32 0.25, %v523_v49  ;;  %s1048_s5 = scalar_lea.hbm %s1047_s28, 128  ;;  %p1053_p12 = scmp.lt.s32.totalorder %s1047_s28, %s1708_s10 }
  0x69   : > { %445 = vadd.xlane.f32.xlu1 %v444_v17  ;;  %439 = vadd.xlane.f32.xlu0 %v438_v18  ;;  %v565_v18 = vld [vmem:[%s1443_s4 + $0x40] sm:$0xff]  ;;  %p1049_p3 = scmp.ne.s32.totalorder %s1047_s28, %s1048_s5 }
  0x6a   : > { %451 = vadd.xlane.f32.xlu2 %v450_v20  ;;  %787 = vmatmul.msk.f32.gmra.mxu1 %vm321_vm0, %v306_v19 }
  0x6b   : > { %791 = vmatmul.msk.f32.gmra.mxu2 %vm321_vm0, %v310_v23  ;;  %795 = vmatmul.msk.f32.gmra.mxu3 %vm321_vm0, %v314_v24  ;;  %p1050_p9 = pnand %p1049_p3, %p1354_p11 }
  0x6d   : > { %p1051_p10 = pneg %p1050_p9 }
  0x70   : > { %784 = vmatmul.msk.f32.gmra.mxu0 %vm321_vm0, %v303_v2 }
  0x71   : > { %457 = vadd.xlane.f32.xlu1 %v456_v25  ;;  %454 = vadd.xlane.f32.xlu0 %v453_v26  ;;  %v562_v26 = vld [vmem:[%s1443_s4 + $0x28] sm:$0xff] }
  0x72   : > { %460 = vadd.xlane.f32.xlu2 %v459_v27  ;;  %788 = vmatmul.msk.f32.gmra.mxu1 %vm321_vm0, %v307_v22 }
  0x73   : > { %792 = vmatmul.msk.f32.gmra.mxu2 %vm321_vm0, %v311_v28  ;;  %796 = vmatmul.msk.f32.gmra.mxu3 %vm321_vm0, %v315_v29 }
  0x78   : > { %785 = vmatmul.msk.f32.gmra.mxu0 %vm321_vm0, %v304_v13 }
  0x79   : > { %466 = vadd.xlane.f32.xlu1 %v465_v30  ;;  %463 = vadd.xlane.f32.xlu0 %v462_v31 }
  0x7a   : > { %469 = vadd.xlane.f32.xlu2 %v468_v33  ;;  %789 = vmatmul.msk.f32.gmra.mxu1 %vm321_vm0, %v308_v21  ;;  %v558_v21 = vld [vmem:[%s1443_s4 + $0x8] sm:$0xff] }
  0x7b   : > { %793 = vmatmul.msk.f32.gmra.mxu2 %vm321_vm0, %v312_v32  ;;  %797 = vmatmul.msk.f32.gmra.mxu3 %vm321_vm0, %v316_v34 }
  0x81   : > { %475 = vadd.xlane.f32.xlu1 %v474_v35  ;;  %472 = vadd.xlane.f32.xlu0 %v471_v36 }
  0x82   : > { %478 = vadd.xlane.f32.xlu2 %v477_v37 }
  0x89   : > { %481 = vadd.xlane.f32.xlu0 %v480_v38 }
  0xd4   : > { %v443_v42 = vpop.xlane.xlu1 %442  ;;  %v437_v43 = vpop.xlane.xlu0 %436 }
  0xd5   : > { %v449_v45 = vpop.xlane.xlu2 %448  ;;  %v483_v52 = vmul.f32 -0.5, %v437_v43  ;;  %v485_v29 = vmul.f32 -0.5, %v443_v42 }
  0xd6   : > { %v487_v53 = vmul.f32 -0.5, %v449_v45 }
  0xdc   : > { %v1509_v47 = vpop.xlane.xlu1 %445  ;;  %v440_v48 = vpop.xlane.xlu0 %439 }
  0xdd   : > { %v452_v50 = vpop.xlane.xlu2 %451  ;;  %v387_v54 = vpop.f32.mrf.mxu0  ;;  %v484_v4 = vmul.f32 -0.5, %v440_v48 }
  0xde   : > { %v499_v55 = vsub.f32 %v387_v54, %v483_v52  ;;  %v488_v7 = vmul.f32 -0.5, %v452_v50  ;;  %v559_v50 = vld [vmem:[%s1443_s4 + $0x10] sm:$0xff] }
  0xdf   : > { %v399_v56 = vpop.f32.mrf.mxu1 }
  0xe0   : > { %v503_v58 = vsub.f32 %v399_v56, %v487_v53  ;;  %v525_v60 = vsub.f32 %v499_v55, %v1511_v51  ;;  %v563_v56 = vld [vmem:[%s1443_s4 + $0x30] sm:$0xff] }
  0xe2   : > { %v529_v62 = vsub.f32 %v503_v58, %v1511_v51  ;;  %v541_v0 = vadd.f32 -4.0, %v525_v60 }
  0xe4   : > { %v1514_v57 = vpop.xlane.xlu1 %457  ;;  %v455_v59 = vpop.xlane.xlu0 %454  ;;  %v545_v3 = vadd.f32 -4.0, %v529_v62  ;;  %v573_v5 = vmul.f32 %v557_v61, %v541_v0 }
  0xe5   : > { %v461_v63 = vpop.xlane.xlu2 %460  ;;  %v390_v11 = vpop.f32.mrf.mxu0  ;;  %v489_v32 = vmul.f32 -0.5, %v455_v59 }
  0xe6   : > { %v491_v2 = vmul.f32 -0.5, %v461_v63  ;;  %v411_v6 = vpop.f32.mrf.mxu2  ;;  %v577_v8 = vmul.f32 %v561_v1, %v545_v3  ;;  %v423_v10 = vpop.f32.mrf.mxu3  ;;  %589 = vst [vmem:[%s1522_s9] sm:$0xff] %v573_v5  ;;  %v500_v12 = vsub.f32 %v390_v11, %v484_v4  ;;  %v486_v63 = vmul.f32 -0.5, %v1509_v47  ;;  %v570_v1 = vld [vmem:[%s1443_s4 + $0x68] sm:$0xff] }
  0xe7   : > { %v402_v13 = vpop.f32.mrf.mxu1  ;;  %v490_v4 = vmul.f32 -0.5, %v1514_v57 }
  0xe8   : > { %v507_v9 = vsub.f32 %v411_v6, %v491_v2  ;;  %593 = vst [vmem:[%s1522_s9 + $0x20] sm:$0xff] %v577_v8  ;;  %v504_v16 = vsub.f32 %v402_v13, %v488_v7  ;;  %v526_v19 = vsub.f32 %v500_v12, %v1511_v51  ;;  %v569_v7 = vld [vmem:[%s1443_s4 + $0x60] sm:$0xff] }
  0xea   : > { %v533_v15 = vsub.f32 %v507_v9, %v1511_v51  ;;  %v530_v22 = vsub.f32 %v504_v16, %v1511_v51  ;;  %v542_v25 = vadd.f32 -4.0, %v526_v19 }
  0xec   : > { %v467_v14 = vpop.xlane.xlu1 %466  ;;  %v464_v17 = vpop.xlane.xlu0 %463  ;;  %v549_v20 = vadd.f32 -4.0, %v533_v15  ;;  %v546_v28 = vadd.f32 -4.0, %v530_v22  ;;  %v574_v30 = vmul.f32 %v558_v21, %v542_v25  ;;  %v571_v22 = vld [vmem:[%s1443_s4 + $0x70] sm:$0xff] }
  0xed   : > { %v492_v23 = vmul.f32 -0.5, %v464_v17  ;;  %v1531_v24 = vpop.xlane.xlu2 %469  ;;  %v393_v36 = vpop.f32.mrf.mxu0  ;;  %v493_v48 = vmul.f32 -0.5, %v467_v14 }
  0xee   : > { %v581_v27 = vmul.f32 %v565_v18, %v549_v20  ;;  %v414_v31 = vpop.f32.mrf.mxu2  ;;  %v578_v33 = vmul.f32 %v562_v26, %v546_v28  ;;  %v426_v35 = vpop.f32.mrf.mxu3  ;;  %590 = vst [vmem:[%s1522_s9 + $0x8] sm:$0xff] %v574_v30  ;;  %v501_v37 = vsub.f32 %v393_v36, %v485_v29  ;;  %v567_v18 = vld [vmem:[%s1443_s4 + $0x50] sm:$0xff]  ;;  %v564_v28 = vld [vmem:[%s1443_s4 + $0x38] sm:$0xff]  ;;  %v494_v30 = vmul.f32 -0.5, %v1531_v24 }
  0xef   : > { %v508_v34 = vsub.f32 %v414_v31, %v492_v23  ;;  %v405_v38 = vpop.f32.mrf.mxu1  ;;  %v560_v23 = vld [vmem:[%s1443_s4 + $0x18] sm:$0xff] }
  0xf0   : > { %597 = vst [vmem:[%s1522_s9 + $0x40] sm:$0xff] %v581_v27  ;;  %v505_v41 = vsub.f32 %v405_v38, %v489_v32  ;;  %v527_v45 = vsub.f32 %v501_v37, %v1511_v51 }
  0xf1   : > { %594 = vst [vmem:[%s1522_s9 + $0x28] sm:$0xff] %v578_v33  ;;  %v534_v40 = vsub.f32 %v508_v34, %v1511_v51 }
  0xf2   : > { %v531_v52 = vsub.f32 %v505_v41, %v1511_v51  ;;  %v543_v55 = vadd.f32 -4.0, %v527_v45 }
  0xf3   : > { %v550_v49 = vadd.f32 -4.0, %v534_v40  ;;  %v568_v40 = vld [vmem:[%s1443_s4 + $0x58] sm:$0xff] }
  0xf4   : > { %v476_v39 = vpop.xlane.xlu1 %475  ;;  %v473_v43 = vpop.xlane.xlu0 %472  ;;  %v547_v61 = vadd.f32 -4.0, %v531_v52  ;;  %v575_v0 = vmul.f32 %v559_v50, %v543_v55 }
  0xf5   : > { %v496_v42 = vmul.f32 -0.5, %v476_v39  ;;  %v495_v46 = vmul.f32 -0.5, %v473_v43  ;;  %v479_v54 = vpop.xlane.xlu2 %478  ;;  %v582_v60 = vmul.f32 %v566_v44, %v550_v49  ;;  %v572_v43 = vld [vmem:[%s1443_s4 + $0x78] sm:$0xff]  ;;  %s1052_s4 = scalar_lea.hbm %s1708_s10, 4096 }
  0xf6   : > { %v497_v59 = vmul.f32 -0.5, %v479_v54  ;;  %v417_v3 = vpop.f32.mrf.mxu2  ;;  %v579_v5 = vmul.f32 %v563_v56, %v547_v61  ;;  %v429_v9 = vpop.f32.mrf.mxu3  ;;  %591 = vst [vmem:[%s1522_s9 + $0x10] sm:$0xff] %v575_v0  ;;  %p1054_p13 = scmp.lt.s32.totalorder %s1052_s4, %s1048_s5 }
  0xf7   : > { %v512_v53 = vsub.f32 %v426_v35, %v496_v42  ;;  %v511_v58 = vsub.f32 %v423_v10, %v495_v46  ;;  %598 = vst [vmem:[%s1522_s9 + $0x48] sm:$0xff] %v582_v60  ;;  %v509_v8 = vsub.f32 %v417_v3, %v493_v48  ;;  %v396_v10 = vpop.f32.mrf.mxu0  ;;  %v408_v13 = vpop.f32.mrf.mxu1 }
  0xf8   : > { %v513_v11 = vsub.f32 %v429_v9, %v497_v59  ;;  %v502_v12 = vsub.f32 %v396_v10, %v486_v63  ;;  %595 = vst [vmem:[%s1522_s9 + $0x30] sm:$0xff] %v579_v5  ;;  %v506_v15 = vsub.f32 %v408_v13, %v490_v4  ;;  %p1055_p5 = por %p1054_p13, %p1053_p12 }
  0xf9   : > { %v538_v62 = vsub.f32 %v512_v53, %v1511_v51  ;;  %v537_v2 = vsub.f32 %v511_v58, %v1511_v51  ;;  %v535_v57 = vsub.f32 %v509_v8, %v1511_v51 }
  0xfa   : > { %v539_v19 = vsub.f32 %v513_v11, %v1511_v51  ;;  %v528_v20 = vsub.f32 %v502_v12, %v1511_v51  ;;  %v532_v25 = vsub.f32 %v506_v15, %v1511_v51  ;;  %p1056_p7 = pnand %p1055_p5, %p1051_p10 }
  0xfb   : > { %v554_v6 = vadd.f32 -4.0, %v538_v62  ;;  %v553_v47 = vadd.f32 -4.0, %v537_v2  ;;  %v551_v21 = vadd.f32 -4.0, %v535_v57 }
  0xfc   : > { %v482_v16 = vpop.xlane.xlu0 %481  ;;  %v555_v26 = vadd.f32 -4.0, %v539_v19  ;;  %v544_v27 = vadd.f32 -4.0, %v528_v20  ;;  %v548_v32 = vadd.f32 -4.0, %v532_v25 }
  0xfd   : > { %v586_v14 = vmul.f32 %v570_v1, %v554_v6  ;;  %v585_v17 = vmul.f32 %v569_v7, %v553_v47  ;;  %v498_v29 = vmul.f32 -0.5, %v482_v16  ;;  %v583_v31 = vmul.f32 %v567_v18, %v551_v21 }
  0xfe   : > { %v587_v33 = vmul.f32 %v571_v22, %v555_v26  ;;  %v576_v34 = vmul.f32 %v560_v23, %v544_v27  ;;  %v420_v35 = vpop.f32.mrf.mxu2  ;;  %v580_v36 = vmul.f32 %v564_v28, %v548_v32  ;;  %v432_v38 = vpop.f32.mrf.mxu3 }
  0xff   : > { %602 = vst [vmem:[%s1522_s9 + $0x68] sm:$0xff] %v586_v14  ;;  %v510_v37 = vsub.f32 %v420_v35, %v494_v30  ;;  %v514_v39 = vsub.f32 %v432_v38, %v498_v29 }
 0x100   : > { %601 = vst [vmem:[%s1522_s9 + $0x60] sm:$0xff] %v585_v17 }
 0x101   : > { %599 = vst [vmem:[%s1522_s9 + $0x50] sm:$0xff] %v583_v31  ;;  %v536_v24 = vsub.f32 %v510_v37, %v1511_v51  ;;  %v540_v41 = vsub.f32 %v514_v39, %v1511_v51 }
 0x102   : > { %603 = vst [vmem:[%s1522_s9 + $0x70] sm:$0xff] %v587_v33 }
 0x103   : > { %592 = vst [vmem:[%s1522_s9 + $0x18] sm:$0xff] %v576_v34  ;;  %v552_v42 = vadd.f32 -4.0, %v536_v24  ;;  %v556_v44 = vadd.f32 -4.0, %v540_v41 }
 0x104   : > { %596 = vst [vmem:[%s1522_s9 + $0x38] sm:$0xff] %v580_v36 }
 0x105   : > { %v584_v45 = vmul.f32 %v568_v40, %v552_v42  ;;  %v588_v46 = vmul.f32 %v572_v43, %v556_v44 }
 0x107   : > { %600 = vst [vmem:[%s1522_s9 + $0x58] sm:$0xff] %v584_v45 }
 0x108   : > { %604 = vst [vmem:[%s1522_s9 + $0x78] sm:$0xff] %v588_v46 }
 0x109   : > { %1059 = shalt.err (!%p1056_p7)
}
 0x10a   : > { %s1203_s18 = smov 128   ;;  %s1204_s1 = smov 256  }
 0x10b   : > { %s1205_s9 = smov 8  }
 0x10c   : > { %823 = dma.vmem_to_hbm [thread:$0]  (%p1354_p11), %s623_s0, 2048, %s625_s6, %s606_s11, %s1203_s18, %s1204_s1, %s1205_s9  }
 0x10d PF: > { %s1710_s21 = sld [smem:[#allocation11_spill]]  ;;  %p837_p4 = scmp.ge.s32.totalorder %s1198_s27, 2 }
 0x10f   : > { %p833_p2 = pnand %p837_p4, %p1362_p1 }
 0x111   : > { %p834_p6 = pneg %p833_p2 }
 0x113   : > { %s639_s3 = sand.u32 1, %s1710_s21  }
 0x114   : > { %s640_s29 = scalar_lea.sflag [#allocation4], %s639_s3 }
 0x115   : > { %1133 = dma.done.wait (%p834_p6), %s640_s29, 2048  }
 0x116   : > { %1135 = vsyncadd (%p834_p6), %s640_s29, 4294965248  ;;  %s22_s27 = sadd.s32 1, %s1198_s27   ;;  %s1713_s12 = sld [smem:[#allocation12_spill]] }
 0x117   : > { %p1597_p0 = scmp.ge.s32.totalorder %s22_s27, 34   ;;  %s1714_s0 = smov %s1416_s13 }
 0x118   : > { %s1715_s8 = sld [smem:[#allocation13_spill]]  ;;  %s1722_s13 = smov %s1146_s14 }
 0x119   : > { %s1716_s20 = sld [smem:[#allocation21_spill]]  ;;  %s1723_s14 = smov %s1419_s24 }
 0x11a   : > { %s1717_s21 = sld [smem:[#allocation17_spill]]  ;;  %s1724_s15 = smov %s1154_s16 }
 0x11b   : > { %s1718_s6 = sld [smem:[#allocation18_spill]]  ;;  %s1725_s16 = smov %s1158_s17 }
 0x11c   : > { %s1719_s11 = sld [smem:[#allocation19_spill]]  ;;  %s1726_s17 = smov %s1714_s0 }
 0x11d   : > { %s1720_s28 = sld [smem:[#allocation23_spill]]  ;;  %s1727_s18 = smov %s1166_s19 }
 0x11e   : > { %s1728_s19 = smov %s1715_s8  ;;  %s1729_s22 = smov %s1190_s25 }
 0x11f   : > { %s1730_s23 = smov %s1194_s26  ;;  %21 = sbr.rel (!%p1597_p0) target bundleno = 17 (0x11), region = 93 }
 0x121   : > { %s1731_s24 = smov %s1718_s6 }
 0x122   : > { %s1732_s25 = smov %s1719_s11 }
 0x123   : > { %s1733_s26 = smov %s1720_s28 }
 0x124   :  { %646 = vsyncpa [#allocation3], 1 }
 0x125   :  { %648 = vsyncpa [#allocation3 + $0x1], 1 }
 0x126   :  { %649 = vsyncpa [#allocation6], 1 }
 0x127   :  { %651 = vsyncpa [#allocation6 + $0x1], 1 }
 0x128   :  { %652 = vsyncpa [#allocation4], 1 }
 0x129   :  { %654 = vsyncpa [#allocation4 + $0x1], 1 }

</bundles_post_ra>
